<compile_context>
chip_gen: v5e
topology: v5e:2x2
jax: 0.10.0
libtpu: 0.0.40
codegen_flags: <defaults>
</compile_context>

<pallas_src>
import jax
import jax.numpy as jnp
from jax import lax
from jax.experimental import pallas as pl
from jax.experimental.pallas import tpu as pltpu


def lstm_tagger_kernel(sent_ref, emb_ref, wih_ref, whh_ref, b_ref,
                       wout_ref, bout_ref, vals_ref, idx_ref):
    """Embedding gather + full-sequence LSTM + linear + max/argmax, grid-less.

    sent_ref : (S,)    i32  SMEM  token ids
    emb_ref  : (V, E)  f32  VMEM  embedding table
    wih_ref  : (E, 4H) f32  VMEM  LSTM input->gates weights (pre-transposed, i|f|g|o)
    whh_ref  : (H, 4H) f32  VMEM  LSTM hidden->gates weights (pre-transposed)
    b_ref    : (1, 4H) f32  VMEM  b_ih + b_hh (pre-summed)
    wout_ref : (T, H)  f32  VMEM  hidden2tag weight (PyTorch layout)
    bout_ref : (T, 1)  f32  VMEM  hidden2tag bias (column vector)
    vals_ref : (1, S)  f32  out   max over tag dim   (torch.max values)
    idx_ref  : (1, S)  i32  out   argmax over tag dim (torch.max indices)
    """
    S = sent_ref.shape[0]
    H = whh_ref.shape[0]
    T = wout_ref.shape[0]

    # ---- In-kernel embedding gather (dynamic sublane reads from VMEM). ----
    rows = [emb_ref[pl.ds(sent_ref[t], 1), :] for t in range(S)]   # S x (1, E)
    embeds = jnp.concatenate(rows, axis=0)                          # (S, E) f32

    # ---- Hoisted input projection: one matmul for all steps + bias. ----
    x_gates = jnp.dot(embeds, wih_ref[...],
                      preferred_element_type=jnp.float32) + b_ref[...]   # (S, 4H)

    # Loop-invariant recurrent weight, loaded once and kept resident.
    whh = whh_ref[...]                                               # (H, 4H)

    # h0 = c0 = 0 (PyTorch default when no hidden state is passed). Carried
    # in values (vregs) across the unrolled recurrence, f32 throughout.
    h = jnp.zeros((1, H), jnp.float32)
    c = jnp.zeros((1, H), jnp.float32)
    hs = []

    # ---- Fully unrolled recurrence (S is static and small). ----
    for t in range(S):
        gates = x_gates[t:t + 1, :] + jnp.dot(
            h, whh, preferred_element_type=jnp.float32)              # (1, 4H)

        # Two full-vreg EUP ops instead of four sub-vreg ones; slice after.
        sig = jax.nn.sigmoid(gates)
        tnh = jnp.tanh(gates)
        i_g = sig[:, 0 * H:1 * H]
        f_g = sig[:, 1 * H:2 * H]
        g_g = tnh[:, 2 * H:3 * H]
        o_g = sig[:, 3 * H:4 * H]

        c = f_g * c + i_g * g_g
        h = o_g * jnp.tanh(c)
        hs.append(h)                                                 # stays in vregs

    hs_all = jnp.concatenate(hs, axis=0)                             # (S, H) f32

    # ---- hidden2tag, computed transposed: tag_space_t[t, s] = wout[t].hs[s] + b[t]. ----
    tag_space_t = lax.dot_general(
        wout_ref[...], hs_all,
        dimension_numbers=(((1,), (1,)), ((), ())),
        preferred_element_type=jnp.float32) + bout_ref[...]          # (T, S)

    # torch.max(tag_space, dim=1): values + first-occurrence argmax.
    vals = jnp.max(tag_space_t, axis=0, keepdims=True)               # (1, S)
    ids = lax.broadcasted_iota(jnp.int32, tag_space_t.shape, 0)
    idx = jnp.min(jnp.where(tag_space_t == vals, ids, T),
                  axis=0, keepdims=True)                             # (1, S)

    vals_ref[...] = vals
    idx_ref[...] = idx.astype(jnp.int32)


def prepare_params(params):
    """One-time (init-time) layout prep so the per-call wrapper is op-free."""
    H = params["w_hh"].shape[1]
    T = params["w_out"].shape[0]
    return {
        "embedding": params["embedding"],                              # (V, E)
        "w_ih_t": jnp.transpose(params["w_ih"]),                       # (E, 4H)
        "w_hh_t": jnp.transpose(params["w_hh"]),                       # (H, 4H)
        "b": (params["b_ih"] + params["b_hh"]).reshape(1, 4 * H),      # (1, 4H)
        "w_out": params["w_out"],                                      # (T, H)
        "b_out": params["b_out"].reshape(T, 1),                        # (T, 1)
    }


def lstm_tagger_forward(sentence, prepared):
    """Per-call path: a single pallas_call, no wrapper-side layout ops."""
    S = sentence.shape[0]

    vspec = pl.BlockSpec(memory_space=pltpu.MemorySpace.VMEM)
    sspec = pl.BlockSpec(memory_space=pltpu.MemorySpace.SMEM)

    vals, idx = pl.pallas_call(
        lstm_tagger_kernel,
        out_shape=(
            jax.ShapeDtypeStruct((1, S), jnp.float32),
            jax.ShapeDtypeStruct((1, S), jnp.int32),
        ),
        in_specs=[sspec, vspec, vspec, vspec, vspec, vspec, vspec],
        out_specs=(vspec, vspec),
    )(sentence,
      prepared["embedding"], prepared["w_ih_t"], prepared["w_hh_t"],
      prepared["b"], prepared["w_out"], prepared["b_out"])

    # torch.max(..., dim=1) returns (values, indices), each of shape (S,)
    return vals[0], idx[0]


def init_params(key, embedding_dim, hidden_dim, vocab_size, tagset_size):
    ks = jax.random.split(key, 7)
    scale = 0.1
    return {
        "embedding": scale * jax.random.normal(ks[0], (vocab_size, embedding_dim), jnp.float32),
        "w_ih": scale * jax.random.normal(ks[1], (4 * hidden_dim, embedding_dim), jnp.float32),
        "w_hh": scale * jax.random.normal(ks[2], (4 * hidden_dim, hidden_dim), jnp.float32),
        "b_ih": scale * jax.random.normal(ks[3], (4 * hidden_dim,), jnp.float32),
        "b_hh": scale * jax.random.normal(ks[4], (4 * hidden_dim,), jnp.float32),
        "w_out": scale * jax.random.normal(ks[5], (tagset_size, hidden_dim), jnp.float32),
        "b_out": scale * jax.random.normal(ks[6], (tagset_size,), jnp.float32),
    }


if __name__ == "__main__":
    EMBEDDING_DIM = 32
    HIDDEN_DIM = 32
    VOCAB_SIZE = 50
    TAGSET_SIZE = 8
    SEQ_LEN = 8

    key = jax.random.PRNGKey(0)
    pkey, skey = jax.random.split(key)
    params = init_params(pkey, EMBEDDING_DIM, HIDDEN_DIM, VOCAB_SIZE, TAGSET_SIZE)
    prepared = jax.tree_util.tree_map(jnp.asarray, prepare_params(params))
    sentence = jax.random.randint(skey, (SEQ_LEN,), 0, VOCAB_SIZE, dtype=jnp.int32)

    vals, idx = lstm_tagger_forward(sentence, prepared)
    jax.block_until_ready((vals, idx))
    assert vals.shape == (SEQ_LEN,) and idx.shape == (SEQ_LEN,)
    assert jnp.all((idx >= 0) & (idx < TAGSET_SIZE))
    print("KERNEL_OK")
</pallas_src>

<mosaic_0001>
module attributes {stable_mosaic.version = 11 : i64} {
  func.func @lstm_tagger_kernel(%arg0: memref<8xi32, #tpu.memory_space<smem>>, %arg1: memref<50x32xf32, #tpu.memory_space<vmem>>, %arg2: memref<32x128xf32, #tpu.memory_space<vmem>>, %arg3: memref<32x128xf32, #tpu.memory_space<vmem>>, %arg4: memref<1x128xf32, #tpu.memory_space<vmem>>, %arg5: memref<8x32xf32, #tpu.memory_space<vmem>>, %arg6: memref<8x1xf32, #tpu.memory_space<vmem>>, %arg7: memref<1x8xf32, #tpu.memory_space<vmem>>, %arg8: memref<1x8xi32, #tpu.memory_space<vmem>>) attributes {dimension_semantics = [], scalar_prefetch = 0 : i64, scratch_operands = 0 : i64, tpu.core_type = #tpu.core_type<tc>} {
    %c0 = arith.constant 0 : index
    %0 = memref.load %arg0[%c0] : memref<8xi32, #tpu.memory_space<smem>>
    %1 = arith.index_cast %0 : i32 to index
    %c0_0 = arith.constant 0 : index
    %2 = vector.load %arg1[%1, %c0_0] : memref<50x32xf32, #tpu.memory_space<vmem>>, vector<1x32xf32>
    %c1 = arith.constant 1 : index
    %3 = memref.load %arg0[%c1] : memref<8xi32, #tpu.memory_space<smem>>
    %4 = arith.index_cast %3 : i32 to index
    %c0_1 = arith.constant 0 : index
    %5 = vector.load %arg1[%4, %c0_1] : memref<50x32xf32, #tpu.memory_space<vmem>>, vector<1x32xf32>
    %c2 = arith.constant 2 : index
    %6 = memref.load %arg0[%c2] : memref<8xi32, #tpu.memory_space<smem>>
    %7 = arith.index_cast %6 : i32 to index
    %c0_2 = arith.constant 0 : index
    %8 = vector.load %arg1[%7, %c0_2] : memref<50x32xf32, #tpu.memory_space<vmem>>, vector<1x32xf32>
    %c3 = arith.constant 3 : index
    %9 = memref.load %arg0[%c3] : memref<8xi32, #tpu.memory_space<smem>>
    %10 = arith.index_cast %9 : i32 to index
    %c0_3 = arith.constant 0 : index
    %11 = vector.load %arg1[%10, %c0_3] : memref<50x32xf32, #tpu.memory_space<vmem>>, vector<1x32xf32>
    %c4 = arith.constant 4 : index
    %12 = memref.load %arg0[%c4] : memref<8xi32, #tpu.memory_space<smem>>
    %13 = arith.index_cast %12 : i32 to index
    %c0_4 = arith.constant 0 : index
    %14 = vector.load %arg1[%13, %c0_4] : memref<50x32xf32, #tpu.memory_space<vmem>>, vector<1x32xf32>
    %c5 = arith.constant 5 : index
    %15 = memref.load %arg0[%c5] : memref<8xi32, #tpu.memory_space<smem>>
    %16 = arith.index_cast %15 : i32 to index
    %c0_5 = arith.constant 0 : index
    %17 = vector.load %arg1[%16, %c0_5] : memref<50x32xf32, #tpu.memory_space<vmem>>, vector<1x32xf32>
    %c6 = arith.constant 6 : index
    %18 = memref.load %arg0[%c6] : memref<8xi32, #tpu.memory_space<smem>>
    %19 = arith.index_cast %18 : i32 to index
    %c0_6 = arith.constant 0 : index
    %20 = vector.load %arg1[%19, %c0_6] : memref<50x32xf32, #tpu.memory_space<vmem>>, vector<1x32xf32>
    %c7 = arith.constant 7 : index
    %21 = memref.load %arg0[%c7] : memref<8xi32, #tpu.memory_space<smem>>
    %22 = arith.index_cast %21 : i32 to index
    %c0_7 = arith.constant 0 : index
    %23 = vector.load %arg1[%22, %c0_7] : memref<50x32xf32, #tpu.memory_space<vmem>>, vector<1x32xf32>
    %24 = tpu.concatenate %2, %5, %8, %11, %14, %17, %20, %23 in 0 : vector<1x32xf32>, vector<1x32xf32>, vector<1x32xf32>, vector<1x32xf32>, vector<1x32xf32>, vector<1x32xf32>, vector<1x32xf32>, vector<1x32xf32> -> vector<8x32xf32>
    %c0_8 = arith.constant 0 : index
    %c0_9 = arith.constant 0 : index
    %25 = vector.load %arg2[%c0_8, %c0_9] : memref<32x128xf32, #tpu.memory_space<vmem>>, vector<32x128xf32>
    %cst = arith.constant dense<0.000000e+00> : vector<8x128xf32>
    %26 = tpu.matmul %24, %25, %cst {dimension_numbers = #tpu.dot_dimension_numbers<[1], [0], [0], [1], [0, 0, 1, 1], [], []>} : vector<8x32xf32>, vector<32x128xf32>, vector<8x128xf32> -> vector<8x128xf32>
    %c0_10 = arith.constant 0 : index
    %c0_11 = arith.constant 0 : index
    %27 = vector.load %arg4[%c0_10, %c0_11] : memref<1x128xf32, #tpu.memory_space<vmem>>, vector<1x128xf32>
    %28 = vector.broadcast %27 : vector<1x128xf32> to vector<8x128xf32>
    %29 = arith.addf %26, %28 : vector<8x128xf32>
    %c0_12 = arith.constant 0 : index
    %c0_13 = arith.constant 0 : index
    %30 = vector.load %arg3[%c0_12, %c0_13] : memref<32x128xf32, #tpu.memory_space<vmem>>, vector<32x128xf32>
    %cst_14 = arith.constant 0.000000e+00 : f32
    %31 = vector.broadcast %cst_14 : f32 to vector<1x32xf32>
    %cst_15 = arith.constant 0.000000e+00 : f32
    %32 = vector.broadcast %cst_15 : f32 to vector<1x32xf32>
    %33 = vector.extract_strided_slice %29 {offsets = [0, 0], sizes = [1, 128], strides = [1, 1]} : vector<8x128xf32> to vector<1x128xf32>
    %cst_16 = arith.constant dense<0.000000e+00> : vector<1x128xf32>
    %34 = tpu.matmul %31, %30, %cst_16 {dimension_numbers = #tpu.dot_dimension_numbers<[1], [0], [0], [1], [0, 0, 1, 1], [], []>} : vector<1x32xf32>, vector<32x128xf32>, vector<1x128xf32> -> vector<1x128xf32>
    %35 = arith.addf %33, %34 : vector<1x128xf32>
    %36 = arith.negf %35 : vector<1x128xf32>
    %37 = math.exp %36 : vector<1x128xf32>
    %cst_17 = arith.constant 1.000000e+00 : f32
    %38 = vector.broadcast %cst_17 : f32 to vector<1x128xf32>
    %39 = arith.addf %38, %37 : vector<1x128xf32>
    %40 = arith.divf %38, %39 : vector<1x128xf32>
    %41 = math.tanh %35 : vector<1x128xf32>
    %42 = vector.extract_strided_slice %40 {offsets = [0, 0], sizes = [1, 32], strides = [1, 1]} : vector<1x128xf32> to vector<1x32xf32>
    %43 = vector.extract_strided_slice %40 {offsets = [0, 32], sizes = [1, 32], strides = [1, 1]} : vector<1x128xf32> to vector<1x32xf32>
    %44 = vector.extract_strided_slice %41 {offsets = [0, 64], sizes = [1, 32], strides = [1, 1]} : vector<1x128xf32> to vector<1x32xf32>
    %45 = vector.extract_strided_slice %40 {offsets = [0, 96], sizes = [1, 32], strides = [1, 1]} : vector<1x128xf32> to vector<1x32xf32>
    %46 = arith.mulf %43, %32 : vector<1x32xf32>
    %47 = arith.mulf %42, %44 : vector<1x32xf32>
    %48 = arith.addf %46, %47 : vector<1x32xf32>
    %49 = math.tanh %48 : vector<1x32xf32>
    %50 = arith.mulf %45, %49 : vector<1x32xf32>
    %51 = vector.extract_strided_slice %29 {offsets = [1, 0], sizes = [1, 128], strides = [1, 1]} : vector<8x128xf32> to vector<1x128xf32>
    %cst_18 = arith.constant dense<0.000000e+00> : vector<1x128xf32>
    %52 = tpu.matmul %50, %30, %cst_18 {dimension_numbers = #tpu.dot_dimension_numbers<[1], [0], [0], [1], [0, 0, 1, 1], [], []>} : vector<1x32xf32>, vector<32x128xf32>, vector<1x128xf32> -> vector<1x128xf32>
    %53 = arith.addf %51, %52 : vector<1x128xf32>
    %54 = arith.negf %53 : vector<1x128xf32>
    %55 = math.exp %54 : vector<1x128xf32>
    %cst_19 = arith.constant 1.000000e+00 : f32
    %56 = vector.broadcast %cst_19 : f32 to vector<1x128xf32>
    %57 = arith.addf %56, %55 : vector<1x128xf32>
    %58 = arith.divf %56, %57 : vector<1x128xf32>
    %59 = math.tanh %53 : vector<1x128xf32>
    %60 = vector.extract_strided_slice %58 {offsets = [0, 0], sizes = [1, 32], strides = [1, 1]} : vector<1x128xf32> to vector<1x32xf32>
    %61 = vector.extract_strided_slice %58 {offsets = [0, 32], sizes = [1, 32], strides = [1, 1]} : vector<1x128xf32> to vector<1x32xf32>
    %62 = vector.extract_strided_slice %59 {offsets = [0, 64], sizes = [1, 32], strides = [1, 1]} : vector<1x128xf32> to vector<1x32xf32>
    %63 = vector.extract_strided_slice %58 {offsets = [0, 96], sizes = [1, 32], strides = [1, 1]} : vector<1x128xf32> to vector<1x32xf32>
    %64 = arith.mulf %61, %48 : vector<1x32xf32>
    %65 = arith.mulf %60, %62 : vector<1x32xf32>
    %66 = arith.addf %64, %65 : vector<1x32xf32>
    %67 = math.tanh %66 : vector<1x32xf32>
    %68 = arith.mulf %63, %67 : vector<1x32xf32>
    %69 = vector.extract_strided_slice %29 {offsets = [2, 0], sizes = [1, 128], strides = [1, 1]} : vector<8x128xf32> to vector<1x128xf32>
    %cst_20 = arith.constant dense<0.000000e+00> : vector<1x128xf32>
    %70 = tpu.matmul %68, %30, %cst_20 {dimension_numbers = #tpu.dot_dimension_numbers<[1], [0], [0], [1], [0, 0, 1, 1], [], []>} : vector<1x32xf32>, vector<32x128xf32>, vector<1x128xf32> -> vector<1x128xf32>
    %71 = arith.addf %69, %70 : vector<1x128xf32>
    %72 = arith.negf %71 : vector<1x128xf32>
    %73 = math.exp %72 : vector<1x128xf32>
    %cst_21 = arith.constant 1.000000e+00 : f32
    %74 = vector.broadcast %cst_21 : f32 to vector<1x128xf32>
    %75 = arith.addf %74, %73 : vector<1x128xf32>
    %76 = arith.divf %74, %75 : vector<1x128xf32>
    %77 = math.tanh %71 : vector<1x128xf32>
    %78 = vector.extract_strided_slice %76 {offsets = [0, 0], sizes = [1, 32], strides = [1, 1]} : vector<1x128xf32> to vector<1x32xf32>
    %79 = vector.extract_strided_slice %76 {offsets = [0, 32], sizes = [1, 32], strides = [1, 1]} : vector<1x128xf32> to vector<1x32xf32>
    %80 = vector.extract_strided_slice %77 {offsets = [0, 64], sizes = [1, 32], strides = [1, 1]} : vector<1x128xf32> to vector<1x32xf32>
    %81 = vector.extract_strided_slice %76 {offsets = [0, 96], sizes = [1, 32], strides = [1, 1]} : vector<1x128xf32> to vector<1x32xf32>
    %82 = arith.mulf %79, %66 : vector<1x32xf32>
    %83 = arith.mulf %78, %80 : vector<1x32xf32>
    %84 = arith.addf %82, %83 : vector<1x32xf32>
    %85 = math.tanh %84 : vector<1x32xf32>
    %86 = arith.mulf %81, %85 : vector<1x32xf32>
    %87 = vector.extract_strided_slice %29 {offsets = [3, 0], sizes = [1, 128], strides = [1, 1]} : vector<8x128xf32> to vector<1x128xf32>
    %cst_22 = arith.constant dense<0.000000e+00> : vector<1x128xf32>
    %88 = tpu.matmul %86, %30, %cst_22 {dimension_numbers = #tpu.dot_dimension_numbers<[1], [0], [0], [1], [0, 0, 1, 1], [], []>} : vector<1x32xf32>, vector<32x128xf32>, vector<1x128xf32> -> vector<1x128xf32>
    %89 = arith.addf %87, %88 : vector<1x128xf32>
    %90 = arith.negf %89 : vector<1x128xf32>
    %91 = math.exp %90 : vector<1x128xf32>
    %cst_23 = arith.constant 1.000000e+00 : f32
    %92 = vector.broadcast %cst_23 : f32 to vector<1x128xf32>
    %93 = arith.addf %92, %91 : vector<1x128xf32>
    %94 = arith.divf %92, %93 : vector<1x128xf32>
    %95 = math.tanh %89 : vector<1x128xf32>
    %96 = vector.extract_strided_slice %94 {offsets = [0, 0], sizes = [1, 32], strides = [1, 1]} : vector<1x128xf32> to vector<1x32xf32>
    %97 = vector.extract_strided_slice %94 {offsets = [0, 32], sizes = [1, 32], strides = [1, 1]} : vector<1x128xf32> to vector<1x32xf32>
    %98 = vector.extract_strided_slice %95 {offsets = [0, 64], sizes = [1, 32], strides = [1, 1]} : vector<1x128xf32> to vector<1x32xf32>
    %99 = vector.extract_strided_slice %94 {offsets = [0, 96], sizes = [1, 32], strides = [1, 1]} : vector<1x128xf32> to vector<1x32xf32>
    %100 = arith.mulf %97, %84 : vector<1x32xf32>
    %101 = arith.mulf %96, %98 : vector<1x32xf32>
    %102 = arith.addf %100, %101 : vector<1x32xf32>
    %103 = math.tanh %102 : vector<1x32xf32>
    %104 = arith.mulf %99, %103 : vector<1x32xf32>
    %105 = vector.extract_strided_slice %29 {offsets = [4, 0], sizes = [1, 128], strides = [1, 1]} : vector<8x128xf32> to vector<1x128xf32>
    %cst_24 = arith.constant dense<0.000000e+00> : vector<1x128xf32>
    %106 = tpu.matmul %104, %30, %cst_24 {dimension_numbers = #tpu.dot_dimension_numbers<[1], [0], [0], [1], [0, 0, 1, 1], [], []>} : vector<1x32xf32>, vector<32x128xf32>, vector<1x128xf32> -> vector<1x128xf32>
    %107 = arith.addf %105, %106 : vector<1x128xf32>
    %108 = arith.negf %107 : vector<1x128xf32>
    %109 = math.exp %108 : vector<1x128xf32>
    %cst_25 = arith.constant 1.000000e+00 : f32
    %110 = vector.broadcast %cst_25 : f32 to vector<1x128xf32>
    %111 = arith.addf %110, %109 : vector<1x128xf32>
    %112 = arith.divf %110, %111 : vector<1x128xf32>
    %113 = math.tanh %107 : vector<1x128xf32>
    %114 = vector.extract_strided_slice %112 {offsets = [0, 0], sizes = [1, 32], strides = [1, 1]} : vector<1x128xf32> to vector<1x32xf32>
    %115 = vector.extract_strided_slice %112 {offsets = [0, 32], sizes = [1, 32], strides = [1, 1]} : vector<1x128xf32> to vector<1x32xf32>
    %116 = vector.extract_strided_slice %113 {offsets = [0, 64], sizes = [1, 32], strides = [1, 1]} : vector<1x128xf32> to vector<1x32xf32>
    %117 = vector.extract_strided_slice %112 {offsets = [0, 96], sizes = [1, 32], strides = [1, 1]} : vector<1x128xf32> to vector<1x32xf32>
    %118 = arith.mulf %115, %102 : vector<1x32xf32>
    %119 = arith.mulf %114, %116 : vector<1x32xf32>
    %120 = arith.addf %118, %119 : vector<1x32xf32>
    %121 = math.tanh %120 : vector<1x32xf32>
    %122 = arith.mulf %117, %121 : vector<1x32xf32>
    %123 = vector.extract_strided_slice %29 {offsets = [5, 0], sizes = [1, 128], strides = [1, 1]} : vector<8x128xf32> to vector<1x128xf32>
    %cst_26 = arith.constant dense<0.000000e+00> : vector<1x128xf32>
    %124 = tpu.matmul %122, %30, %cst_26 {dimension_numbers = #tpu.dot_dimension_numbers<[1], [0], [0], [1], [0, 0, 1, 1], [], []>} : vector<1x32xf32>, vector<32x128xf32>, vector<1x128xf32> -> vector<1x128xf32>
    %125 = arith.addf %123, %124 : vector<1x128xf32>
    %126 = arith.negf %125 : vector<1x128xf32>
    %127 = math.exp %126 : vector<1x128xf32>
    %cst_27 = arith.constant 1.000000e+00 : f32
    %128 = vector.broadcast %cst_27 : f32 to vector<1x128xf32>
    %129 = arith.addf %128, %127 : vector<1x128xf32>
    %130 = arith.divf %128, %129 : vector<1x128xf32>
    %131 = math.tanh %125 : vector<1x128xf32>
    %132 = vector.extract_strided_slice %130 {offsets = [0, 0], sizes = [1, 32], strides = [1, 1]} : vector<1x128xf32> to vector<1x32xf32>
    %133 = vector.extract_strided_slice %130 {offsets = [0, 32], sizes = [1, 32], strides = [1, 1]} : vector<1x128xf32> to vector<1x32xf32>
    %134 = vector.extract_strided_slice %131 {offsets = [0, 64], sizes = [1, 32], strides = [1, 1]} : vector<1x128xf32> to vector<1x32xf32>
    %135 = vector.extract_strided_slice %130 {offsets = [0, 96], sizes = [1, 32], strides = [1, 1]} : vector<1x128xf32> to vector<1x32xf32>
    %136 = arith.mulf %133, %120 : vector<1x32xf32>
    %137 = arith.mulf %132, %134 : vector<1x32xf32>
    %138 = arith.addf %136, %137 : vector<1x32xf32>
    %139 = math.tanh %138 : vector<1x32xf32>
    %140 = arith.mulf %135, %139 : vector<1x32xf32>
    %141 = vector.extract_strided_slice %29 {offsets = [6, 0], sizes = [1, 128], strides = [1, 1]} : vector<8x128xf32> to vector<1x128xf32>
    %cst_28 = arith.constant dense<0.000000e+00> : vector<1x128xf32>
    %142 = tpu.matmul %140, %30, %cst_28 {dimension_numbers = #tpu.dot_dimension_numbers<[1], [0], [0], [1], [0, 0, 1, 1], [], []>} : vector<1x32xf32>, vector<32x128xf32>, vector<1x128xf32> -> vector<1x128xf32>
    %143 = arith.addf %141, %142 : vector<1x128xf32>
    %144 = arith.negf %143 : vector<1x128xf32>
    %145 = math.exp %144 : vector<1x128xf32>
    %cst_29 = arith.constant 1.000000e+00 : f32
    %146 = vector.broadcast %cst_29 : f32 to vector<1x128xf32>
    %147 = arith.addf %146, %145 : vector<1x128xf32>
    %148 = arith.divf %146, %147 : vector<1x128xf32>
    %149 = math.tanh %143 : vector<1x128xf32>
    %150 = vector.extract_strided_slice %148 {offsets = [0, 0], sizes = [1, 32], strides = [1, 1]} : vector<1x128xf32> to vector<1x32xf32>
    %151 = vector.extract_strided_slice %148 {offsets = [0, 32], sizes = [1, 32], strides = [1, 1]} : vector<1x128xf32> to vector<1x32xf32>
    %152 = vector.extract_strided_slice %149 {offsets = [0, 64], sizes = [1, 32], strides = [1, 1]} : vector<1x128xf32> to vector<1x32xf32>
    %153 = vector.extract_strided_slice %148 {offsets = [0, 96], sizes = [1, 32], strides = [1, 1]} : vector<1x128xf32> to vector<1x32xf32>
    %154 = arith.mulf %151, %138 : vector<1x32xf32>
    %155 = arith.mulf %150, %152 : vector<1x32xf32>
    %156 = arith.addf %154, %155 : vector<1x32xf32>
    %157 = math.tanh %156 : vector<1x32xf32>
    %158 = arith.mulf %153, %157 : vector<1x32xf32>
    %159 = vector.extract_strided_slice %29 {offsets = [7, 0], sizes = [1, 128], strides = [1, 1]} : vector<8x128xf32> to vector<1x128xf32>
    %cst_30 = arith.constant dense<0.000000e+00> : vector<1x128xf32>
    %160 = tpu.matmul %158, %30, %cst_30 {dimension_numbers = #tpu.dot_dimension_numbers<[1], [0], [0], [1], [0, 0, 1, 1], [], []>} : vector<1x32xf32>, vector<32x128xf32>, vector<1x128xf32> -> vector<1x128xf32>
    %161 = arith.addf %159, %160 : vector<1x128xf32>
    %162 = arith.negf %161 : vector<1x128xf32>
    %163 = math.exp %162 : vector<1x128xf32>
    %cst_31 = arith.constant 1.000000e+00 : f32
    %164 = vector.broadcast %cst_31 : f32 to vector<1x128xf32>
    %165 = arith.addf %164, %163 : vector<1x128xf32>
    %166 = arith.divf %164, %165 : vector<1x128xf32>
    %167 = math.tanh %161 : vector<1x128xf32>
    %168 = vector.extract_strided_slice %166 {offsets = [0, 0], sizes = [1, 32], strides = [1, 1]} : vector<1x128xf32> to vector<1x32xf32>
    %169 = vector.extract_strided_slice %166 {offsets = [0, 32], sizes = [1, 32], strides = [1, 1]} : vector<1x128xf32> to vector<1x32xf32>
    %170 = vector.extract_strided_slice %167 {offsets = [0, 64], sizes = [1, 32], strides = [1, 1]} : vector<1x128xf32> to vector<1x32xf32>
    %171 = vector.extract_strided_slice %166 {offsets = [0, 96], sizes = [1, 32], strides = [1, 1]} : vector<1x128xf32> to vector<1x32xf32>
    %172 = arith.mulf %169, %156 : vector<1x32xf32>
    %173 = arith.mulf %168, %170 : vector<1x32xf32>
    %174 = arith.addf %172, %173 : vector<1x32xf32>
    %175 = math.tanh %174 : vector<1x32xf32>
    %176 = arith.mulf %171, %175 : vector<1x32xf32>
    %177 = tpu.concatenate %50, %68, %86, %104, %122, %140, %158, %176 in 0 : vector<1x32xf32>, vector<1x32xf32>, vector<1x32xf32>, vector<1x32xf32>, vector<1x32xf32>, vector<1x32xf32>, vector<1x32xf32>, vector<1x32xf32> -> vector<8x32xf32>
    %c0_32 = arith.constant 0 : index
    %c0_33 = arith.constant 0 : index
    %178 = vector.load %arg5[%c0_32, %c0_33] : memref<8x32xf32, #tpu.memory_space<vmem>>, vector<8x32xf32>
    %cst_34 = arith.constant dense<0.000000e+00> : vector<8x8xf32>
    %179 = tpu.matmul %178, %177, %cst_34 {dimension_numbers = #tpu.dot_dimension_numbers<[1], [1], [0], [0], [0, 0, 1, 0], [], []>} : vector<8x32xf32>, vector<8x32xf32>, vector<8x8xf32> -> vector<8x8xf32>
    %c0_35 = arith.constant 0 : index
    %c0_36 = arith.constant 0 : index
    %180 = vector.load %arg6[%c0_35, %c0_36] : memref<8x1xf32, #tpu.memory_space<vmem>>, vector<8x1xf32>
    %181 = vector.broadcast %180 : vector<8x1xf32> to vector<8x8xf32>
    %182 = arith.addf %179, %181 : vector<8x8xf32>
    %cst_37 = arith.constant dense<0xFF800000> : vector<8xf32>
    %183 = vector.multi_reduction <maximumf>, %182, %cst_37 [0] : vector<8x8xf32> to vector<8xf32>
    %184 = vector.shape_cast %183 : vector<8xf32> to vector<1x8xf32>
    %185 = tpu.iota {dimensions = array<i32: 0>} : vector<8x8xi32>
    %186 = vector.broadcast %184 : vector<1x8xf32> to vector<8x8xf32>
    %187 = arith.cmpf oeq, %182, %186 : vector<8x8xf32>
    %c8_i32 = arith.constant 8 : i32
    %188 = vector.broadcast %c8_i32 : i32 to vector<8x8xi32>
    %189 = arith.select %187, %185, %188 : vector<8x8xi1>, vector<8x8xi32>
    %cst_38 = arith.constant dense<2147483647> : vector<8xi32>
    %190 = vector.multi_reduction <minsi>, %189, %cst_38 [0] : vector<8x8xi32> to vector<8xi32>
    %191 = vector.shape_cast %190 : vector<8xi32> to vector<1x8xi32>
    %c0_39 = arith.constant 0 : index
    %c0_40 = arith.constant 0 : index
    %192 = vector.load %arg7[%c0_39, %c0_40] : memref<1x8xf32, #tpu.memory_space<vmem>>, vector<1x8xf32>
    tpu.vector_store %arg7[%c0_39, %c0_40], %184 {strides = array<i32>} : memref<1x8xf32, #tpu.memory_space<vmem>>, vector<1x8xf32>,
    %c0_41 = arith.constant 0 : index
    %c0_42 = arith.constant 0 : index
    %193 = vector.load %arg8[%c0_41, %c0_42] : memref<1x8xi32, #tpu.memory_space<vmem>>, vector<1x8xi32>
    tpu.vector_store %arg8[%c0_41, %c0_42], %191 {strides = array<i32>} : memref<1x8xi32, #tpu.memory_space<vmem>>, vector<1x8xi32>,
    return
  }
}

</mosaic_0001>

<bundles_post_ra>
// kernel: tpu_custom_call.1
= control target key start
LH: loop header
LB: loop body
LE: loop exit
PB: predicated region body
PF: predicated region fallthrough
CT: control target
= control target key end

     0   :  { %14 = vsyncpa [#allocation4], 0  ;;  %s1214_s0 = inlined_call_operand.vmem [shape: s32[8], index: 0, kind: input, shape index: {}]   ;;  %s1215_s1 = inlined_call_operand.vmem [shape: f32[50,32], index: 1, kind: input, shape index: {}]   ;;  %s1216_s2 = inlined_call_operand.vmem [shape: f32[32,128], index: 2, kind: input, shape index: {}]   ;;  %s1217_s3 = inlined_call_operand.vmem [shape: f32[32,128], index: 3, kind: input, shape index: {}]   ;;  %s1218_s4 = inlined_call_operand.vmem [shape: f32[1,128], index: 4, kind: input, shape index: {}]   ;;  %s1219_s5 = inlined_call_operand.vmem [shape: f32[8,32], index: 5, kind: input, shape index: {}]   ;;  %s1220_s6 = inlined_call_operand.vmem [shape: f32[8,1], index: 6, kind: input, shape index: {}]   ;;  %s1221_s7 = inlined_call_operand.hbm [shape: f32[1,8], index: 7, kind: output, shape index: {0}]   ;;  %s1222_s8 = inlined_call_operand.hbm [shape: s32[1,8], index: 8, kind: output, shape index: {1}]  }
   0x1   :  { %15 = vsyncpa [#allocation3], 0 }
   0x2   :  { %16 = vsyncpa [#allocation7], 0  ;;  %s22_s29 = sshll.u32 %s1214_s0, 4  ;;  %s961_s30 = smov [#allocation2]   ;;  %s23_s29 = int_to_ptr.vmem [resolvable:$true] %s22_s29 }
   0x3   :  { %25 = dma.vmem_to_smem %s23_s29, 16, %s961_s30, [#allocation4]  }
   0x4   :  { %955 = dma.done.wait [#allocation4], 16  }
   0x5   :  { %956 = vsyncadd [#allocation4], 4294967280 }
   0x6   :  { %42 = sfence }
   0x7   :  { %v105_v0 = vld [vmem:[%s1216_s2 + $0x18] sm:$0xff]  ;;  %v104_v1 = vld [vmem:[%s1216_s2 + $0x10] sm:$0xff]  ;;  %s1027_s0 = sld [smem:[#allocation2]]  ;;  %v103_v4 = vld [vmem:[%s1216_s2 + $0x8] sm:$0xff]  ;;  %vm88_vm0 = vcmask 1040384   ;;  %v962_v10 = vmov 0.0  }
   0x8   :  { %v1025_v2 = vld [vmem:[%s1217_s3 + $0x18] sm:$0xff]  ;;  %126 = vmatpush.msra.mxu0 %v105_v0  ;;  %v1033_v3 = vld [vmem:[%s1217_s3 + $0x10] sm:$0xff]  ;;  %s796_s17 = sld [smem:[#allocation2 + $0x1]]  ;;  %v1041_v5 = vld [vmem:[%s1217_s3 + $0x8] sm:$0xff]  ;;  %vm90_vm1 = vcmask 1041408   ;;  %vm92_vm2 = vcmask 1042432  }
   0x9   :  { %153 = vmatpush.msra.mxu1 %v1025_v2  ;;  %s1043_s22 = sld [smem:[#allocation2 + $0x2]]  ;;  %216 = vmatpush.msra.mxu2 %v1025_v2  ;;  %v102_v6 = vld [vmem:[%s1216_s2] sm:$0xff]  ;;  %vm94_vm3 = vcmask 1043456   ;;  %vm96_vm4 = vcmask 1044480   ;;  %vm98_vm5 = vcmask 1045504   ;;  %vm100_vm6 = vcmask 1046528  }
   0xa   :  { %286 = vmatpush.msra.mxu3 %v1025_v2  ;;  %127 = vmatpush.msra.mxu0 %v104_v1  ;;  %s1048_s23 = sld [smem:[#allocation2 + $0x3]]  ;;  %v1058_v7 = vld [vmem:[%s1217_s3] sm:$0xff]  ;;  %vm110_vm7 = vcmask 261120  }
   0xb   :  { %154 = vmatpush.msra.mxu1 %v1033_v3  ;;  %s1053_s26 = sld [smem:[#allocation2 + $0x4]]  ;;  %217 = vmatpush.msra.mxu2 %v1033_v3  ;;  %v830_v31 = vld [vmem:[%s1218_s4] ss:$0 sm:$0xff]  ;;  %s964_s4 = smov 32  }
   0xc   :  { %287 = vmatpush.msra.mxu3 %v1033_v3  ;;  %128 = vmatpush.msra.mxu0 %v103_v4  ;;  %s1063_s29 = sld [smem:[#allocation2 + $0x5]] }
   0xd   :  { %155 = vmatpush.msra.mxu1 %v1041_v5  ;;  %s44_s2 = scalar_lea.vmem %s1215_s1, %s1027_s0  ;;  %s1069_s10 = sld [smem:[#allocation2 + $0x6]]  ;;  %218 = vmatpush.msra.mxu2 %v1041_v5 }
   0xe   :  { %288 = vmatpush.msra.mxu3 %v1041_v5  ;;  %129 = vmatpush.msra.mxu0 %v102_v6  ;;  %s47_s12 = scalar_lea.vmem %s1215_s1, %s796_s17  ;;  %s1076_s13 = sld [smem:[#allocation2 + $0x7]]  ;;  %v45_v8 = vld [vmem:[%s44_s2] sm:$0x1] }
   0xf   :  { %156 = vmatpush.msra.mxu1 %v1058_v7  ;;  %v48_v9 = vld [vmem:[%s47_s12] sm:$0x1]  ;;  %s50_s15 = scalar_lea.vmem %s1215_s1, %s1043_s22  ;;  %219 = vmatpush.msra.mxu2 %v1058_v7  ;;  %s963_s2 = smov 64  }
  0x10   :  { %157 = vmatmul.f32.vlgmr.msra.gmra.mxu1 %v962_v10  ;;  %v51_v11 = vld [vmem:[%s50_s15] sm:$0x1]  ;;  %s53_s18 = scalar_lea.vmem %s1215_s1, %s1048_s23  ;;  %v68_v12 = vrot.slane %v48_v9, 7  ;;  %289 = vmatpush.msra.mxu3 %v1058_v7  ;;  %s762_s15 = sshll.u32 %s1221_s7, 4  ;;  %s763_s15 = int_to_ptr.hbm [resolvable:$true] %s762_s15 }
  0x11   :  { %356 = vmatpush.msrb.mxu0 %v1025_v2  ;;  %v54_v13 = vld [vmem:[%s53_s18] sm:$0x1]  ;;  %s56_s21 = scalar_lea.vmem %s1215_s1, %s1053_s26  ;;  %v71_v14 = vrot.slane %v51_v11, 6  ;;  %426 = vmatpush.msrb.mxu1 %v1025_v2  ;;  %s773_s18 = sshll.u32 %s1222_s8, 4  ;;  %s774_s18 = int_to_ptr.hbm [resolvable:$true] %s773_s18 }
  0x12   :  { %496 = vmatpush.msrb.mxu2 %v1025_v2  ;;  %v57_v15 = vld [vmem:[%s56_s21] sm:$0x1]  ;;  %s59_s24 = scalar_lea.vmem %s1215_s1, %s1063_s29  ;;  %v74_v16 = vrot.slane %v54_v13, 5  ;;  %v89_v17 = vsel %vm88_vm0, %v45_v8, %v68_v12  ;;  %566 = vmatpush.msrb.mxu3 %v1025_v2 }
  0x13   :  { %357 = vmatpush.msrb.mxu0 %v1033_v3  ;;  %v60_v18 = vld [vmem:[%s59_s24] sm:$0x1]  ;;  %s62_s27 = scalar_lea.vmem %s1215_s1, %s1069_s10  ;;  %v77_v19 = vrot.slane %v57_v15, 4  ;;  %v91_v20 = vsel %vm90_vm1, %v89_v17, %v71_v14  ;;  %427 = vmatpush.msrb.mxu1 %v1033_v3 }
  0x14   :  { %497 = vmatpush.msrb.mxu2 %v1033_v3  ;;  %v63_v21 = vld [vmem:[%s62_s27] sm:$0x1]  ;;  %s65_s30 = scalar_lea.vmem %s1215_s1, %s1076_s13  ;;  %v80_v22 = vrot.slane %v60_v18, 3  ;;  %v93_v23 = vsel %vm92_vm2, %v91_v20, %v74_v16  ;;  %567 = vmatpush.msrb.mxu3 %v1033_v3 }
  0x15   :  { %358 = vmatpush.msrb.mxu0 %v1041_v5  ;;  %v66_v24 = vld [vmem:[%s65_s30] sm:$0x1]  ;;  %v83_v25 = vrot.slane %v63_v21, 2  ;;  %v95_v26 = vsel %vm94_vm3, %v93_v23, %v77_v19  ;;  %428 = vmatpush.msrb.mxu1 %v1041_v5 }
  0x16   :  { %498 = vmatpush.msrb.mxu2 %v1041_v5  ;;  %v86_v27 = vrot.slane %v66_v24, 1  ;;  %v97_v28 = vsel %vm96_vm4, %v95_v26, %v80_v22  ;;  %568 = vmatpush.msrb.mxu3 %v1041_v5 }
  0x17   :  { %359 = vmatpush.msrb.mxu0 %v1058_v7  ;;  %v99_v29 = vsel %vm98_vm5, %v97_v28, %v83_v25  ;;  %429 = vmatpush.msrb.mxu1 %v1058_v7 }
  0x18   :  { %499 = vmatpush.msrb.mxu2 %v1058_v7  ;;  %v101_v30 = vsel %vm100_vm6, %v99_v29, %v86_v27  ;;  %569 = vmatpush.msrb.mxu3 %v1058_v7 }
  0x19   :  { %803 = vmatmul.msk.f32.vlgmr.msra.gmra.mxu0 %vm110_vm7, %v101_v30 }
  0x1a   :  { %636 = vmatpush.msra.mxu0 %v1025_v2 }
  0x1c   :  { %637 = vmatpush.msra.mxu0 %v1033_v3 }
  0x1e   :  { %638 = vmatpush.msra.mxu0 %v1041_v5 }
  0x20   :  { %639 = vmatpush.msra.mxu0 %v1058_v7 }
  0x8d   :  { %v158_v33 = vpop.f32.mrf.mxu1 }
  0x96   :  { %v131_v32 = vpop.f32.mrf.mxu0 }
  0x97   :  { %v1136_v34 = vadd.f32 %v830_v31, %v131_v32 }
  0x99   :  { %v161_v35 = vadd.f32 %v158_v33, %v1136_v34 }
  0x9b   :  { %831 = vtanh.f32 %v161_v35  ;;  %v804_v37 = vmul.f32 -1.442695, %v161_v35 }
  0x9d   :  { %833 = vpow2.f32 %v804_v37 }
  0xa1   :  { %v832_v36 = vpop.eup %831 }
  0xa2   :  { %184 = vrot.lane.b32.xlu0 %v832_v36, %s963_s2 }
  0xa3   :  { %v834_v38 = vpop.eup %833 }
  0xa4   :  { %v165_v39 = vadd.f32 1.0, %v834_v38 }
  0xa6   :  { %835 = vrcp.f32 %v165_v39  ;;  %v177_v45 = vand.u32 2147483648, %v165_v39  ;;  %vm171_vm9 = vweird.f32 %v165_v39  ;;  %v175_v46 = vand.u32 2147483647, %v165_v39 }
  0xa8   :  { %v178_v48 = vor.u32 1.1754944e-38, %v177_v45  ;;  %vm176_vm11 = vcmp.eq.f32.partialorder %v175_v46, 8.507059e+37 }
  0xac   :  { %v836_v40 = vpop.eup %835 }
  0xad   :  { %v167_v41 = vmul.f32 %v836_v40, %v165_v39  ;;  %vm172_vm8 = vweird.f32 %v836_v40 }
  0xae   :  { %vm173_vm10 = vmor %vm171_vm9, %vm172_vm8 }
  0xaf   :  { %v168_v42 = vsub.f32 1.0, %v167_v41 }
  0xb1   :  { %v169_v43 = vmul.f32 %v836_v40, %v168_v42 }
  0xb3   :  { %v170_v44 = vadd.f32 %v836_v40, %v169_v43 }
  0xb5   :  { %v174_v47 = vsel %vm173_vm10, %v836_v40, %v170_v44 }
  0xb6   :  { %v179_v50 = vsel %vm176_vm11, %v178_v48, %v174_v47 }
  0xb7   :  { %v182_v52 = vmul.f32 0.0, %v179_v50 }
 0x114   :  { %v185_v49 = vpop.permute.xlu0 %184 }
 0x115   :  { %v187_v51 = vmul.f32 %v185_v49, %v179_v50 }
 0x117   :  { %189 = vrot.lane.b32.xlu0 %v187_v51, %s964_s4 }
 0x189   :  { %v190_v53 = vpop.permute.xlu0 %189 }
 0x18a   :  { %v192_v54 = vadd.f32 %v190_v53, %v182_v52 }
 0x18c   :  { %837 = vtanh.f32 %v192_v54  ;;  %v249_v14 = vrot.slane %v192_v54, 7 }
 0x192   :  { %v838_v55 = vpop.eup %837 }
 0x193   :  { %195 = vrot.lane.b32.xlu1 %v838_v55, %s963_s2 }
 0x205   :  { %v196_v56 = vpop.permute.xlu1 %195 }
 0x206   :  { %v1142_v57 = vmul.f32 %v196_v56, %v179_v50 }
 0x208   :  { %200 = vrot.lane.b32.xlu1 %v1142_v57, %s964_s4 }
 0x27a   :  { %v201_v58 = vpop.permute.xlu1 %200 }
 0x27b   :  { %805 = vmatmul.msk.f32.vlgmr.msra.gmra.mxu2 %vm110_vm7, %v201_v58 }
 0x2fe   :  { %v221_v59 = vpop.f32.mrf.mxu2 }
 0x2ff   :  { %v225_v60 = vrot.slane %v221_v59, 7 }
 0x301   :  { %v227_v61 = vadd.f32 %v225_v60, %v1136_v34 }
 0x303   :  { %839 = vtanh.f32 %v227_v61  ;;  %v806_v63 = vmul.f32 -1.442695, %v227_v61 }
 0x305   :  { %841 = vpow2.f32 %v806_v63 }
 0x309   :  { %v840_v62 = vpop.eup %839 }
 0x30a   :  { %253 = vrot.lane.b32.xlu2 %v840_v62, %s963_s2 }
 0x30b   :  { %v842_v0 = vpop.eup %841 }
 0x30c   :  { %v231_v1 = vadd.f32 1.0, %v842_v0 }
 0x30e   :  { %843 = vrcp.f32 %v231_v1  ;;  %v243_v7 = vand.u32 2147483648, %v231_v1  ;;  %vm237_vm13 = vweird.f32 %v231_v1  ;;  %v241_v8 = vand.u32 2147483647, %v231_v1 }
 0x310   :  { %v244_v10 = vor.u32 1.1754944e-38, %v243_v7  ;;  %vm242_vm15 = vcmp.eq.f32.partialorder %v241_v8, 8.507059e+37 }
 0x314   :  { %v844_v2 = vpop.eup %843 }
 0x315   :  { %v233_v3 = vmul.f32 %v844_v2, %v231_v1  ;;  %vm238_vm12 = vweird.f32 %v844_v2 }
 0x316   :  { %vm239_vm14 = vmor %vm237_vm13, %vm238_vm12 }
 0x317   :  { %v234_v4 = vsub.f32 1.0, %v233_v3 }
 0x319   :  { %v235_v5 = vmul.f32 %v844_v2, %v234_v4 }
 0x31b   :  { %v236_v6 = vadd.f32 %v844_v2, %v235_v5 }
 0x31d   :  { %v240_v9 = vsel %vm239_vm14, %v844_v2, %v236_v6 }
 0x31e   :  { %v245_v12 = vsel %vm242_vm15, %v244_v10, %v240_v9 }
 0x31f   :  { %v251_v15 = vmul.f32 %v249_v14, %v245_v12 }
 0x364   :  { %v254_v11 = vpop.permute.xlu2 %253 }
 0x365   :  { %v256_v13 = vmul.f32 %v254_v11, %v245_v12 }
 0x367   :  { %258 = vrot.lane.b32.xlu2 %v256_v13, %s964_s4 }
 0x3c1   :  { %v259_v16 = vpop.permute.xlu2 %258 }
 0x3c2   :  { %v261_v17 = vadd.f32 %v259_v16, %v251_v15 }
 0x3c4   :  { %845 = vtanh.f32 %v261_v17  ;;  %v319_v43 = vrot.slane %v261_v17, 7 }
 0x3ca   :  { %v846_v18 = vpop.eup %845 }
 0x3cb   :  { %264 = vrot.lane.b32.xlu0 %v846_v18, %s963_s2 }
 0x43d   :  { %v265_v19 = vpop.permute.xlu0 %264 }
 0x43e   :  { %v267_v20 = vmul.f32 %v265_v19, %v245_v12 }
 0x440   :  { %v269_v21 = vrot.slane %v267_v20, 1  ;;  %v688_v50 = vsel %vm88_vm0, %v1142_v57, %v267_v20 }
 0x442   :  { %270 = vrot.lane.b32.xlu1 %v269_v21, %s964_s4 }
 0x4b4   :  { %v271_v22 = vpop.permute.xlu1 %270 }
 0x4b5   :  { %807 = vmatmul.msk.f32.vlgmr.msra.gmra.mxu3 %vm110_vm7, %v271_v22 }
 0x538   :  { %v291_v23 = vpop.f32.mrf.mxu3 }
 0x539   :  { %v295_v24 = vrot.slane %v291_v23, 6 }
 0x53b   :  { %v297_v25 = vadd.f32 %v295_v24, %v1136_v34 }
 0x53d   :  { %847 = vtanh.f32 %v297_v25  ;;  %v808_v27 = vmul.f32 -1.442695, %v297_v25 }
 0x53f   :  { %849 = vpow2.f32 %v808_v27 }
 0x543   :  { %v848_v26 = vpop.eup %847 }
 0x544   :  { %323 = vrot.lane.b32.xlu2 %v848_v26, %s963_s2 }
 0x545   :  { %v850_v28 = vpop.eup %849 }
 0x546   :  { %v301_v29 = vadd.f32 1.0, %v850_v28 }
 0x548   :  { %851 = vrcp.f32 %v301_v29  ;;  %v313_v36 = vand.u32 2147483648, %v301_v29  ;;  %vm307_vm9 = vweird.f32 %v301_v29  ;;  %v311_v37 = vand.u32 2147483647, %v301_v29 }
 0x54a   :  { %v314_v39 = vor.u32 1.1754944e-38, %v313_v36  ;;  %vm312_vm11 = vcmp.eq.f32.partialorder %v311_v37, 8.507059e+37 }
 0x54e   :  { %v852_v30 = vpop.eup %851 }
 0x54f   :  { %v303_v31 = vmul.f32 %v852_v30, %v301_v29  ;;  %vm308_vm8 = vweird.f32 %v852_v30 }
 0x550   :  { %vm309_vm10 = vmor %vm307_vm9, %vm308_vm8 }
 0x551   :  { %v304_v32 = vsub.f32 1.0, %v303_v31 }
 0x553   :  { %v305_v33 = vmul.f32 %v852_v30, %v304_v32 }
 0x555   :  { %v306_v35 = vadd.f32 %v852_v30, %v305_v33 }
 0x557   :  { %v310_v38 = vsel %vm309_vm10, %v852_v30, %v306_v35 }
 0x558   :  { %v315_v41 = vsel %vm312_vm11, %v314_v39, %v310_v38 }
 0x559   :  { %v321_v44 = vmul.f32 %v319_v43, %v315_v41 }
 0x59e   :  { %v324_v40 = vpop.permute.xlu2 %323 }
 0x59f   :  { %v326_v42 = vmul.f32 %v324_v40, %v315_v41 }
 0x5a1   :  { %328 = vrot.lane.b32.xlu0 %v326_v42, %s964_s4 }
 0x613   :  { %v329_v45 = vpop.permute.xlu0 %328 }
 0x614   :  { %v331_v46 = vadd.f32 %v329_v45, %v321_v44 }
 0x616   :  { %853 = vtanh.f32 %v331_v46  ;;  %v389_v9 = vrot.slane %v331_v46, 7 }
 0x61c   :  { %v854_v47 = vpop.eup %853 }
 0x61d   :  { %334 = vrot.lane.b32.xlu1 %v854_v47, %s963_s2 }
 0x68f   :  { %v335_v48 = vpop.permute.xlu1 %334 }
 0x690   :  { %v337_v49 = vmul.f32 %v335_v48, %v315_v41 }
 0x692   :  { %v339_v51 = vrot.slane %v337_v49, 2  ;;  %v689_v52 = vsel %vm90_vm1, %v688_v50, %v337_v49 }
 0x694   :  { %340 = vrot.lane.b32.xlu2 %v339_v51, %s964_s4 }
 0x6ee   :  { %v341_v53 = vpop.permute.xlu2 %340 }
 0x6ef   :  { %809 = vmatmul.msk.f32.vlgmr.msrb.gmra.mxu0 %vm110_vm7, %v341_v53 }
 0x76c   :  { %v361_v54 = vpop.f32.mrf.mxu0 }
 0x76d   :  { %v365_v55 = vrot.slane %v361_v54, 5 }
 0x76f   :  { %v367_v56 = vadd.f32 %v365_v55, %v1136_v34 }
 0x771   :  { %855 = vtanh.f32 %v367_v56  ;;  %v810_v59 = vmul.f32 -1.442695, %v367_v56 }
 0x773   :  { %857 = vpow2.f32 %v810_v59 }
 0x777   :  { %v856_v58 = vpop.eup %855 }
 0x778   :  { %393 = vrot.lane.b32.xlu0 %v856_v58, %s963_s2 }
 0x779   :  { %v858_v60 = vpop.eup %857 }
 0x77a   :  { %v371_v57 = vadd.f32 1.0, %v858_v60 }
 0x77c   :  { %859 = vrcp.f32 %v371_v57  ;;  %v383_v2 = vand.u32 2147483648, %v371_v57  ;;  %vm377_vm1 = vweird.f32 %v371_v57  ;;  %v381_v3 = vand.u32 2147483647, %v371_v57 }
 0x77e   :  { %v384_v5 = vor.u32 1.1754944e-38, %v383_v2  ;;  %vm382_vm13 = vcmp.eq.f32.partialorder %v381_v3, 8.507059e+37 }
 0x782   :  { %v860_v61 = vpop.eup %859 }
 0x783   :  { %v373_v62 = vmul.f32 %v860_v61, %v371_v57  ;;  %vm378_vm0 = vweird.f32 %v860_v61 }
 0x784   :  { %vm379_vm12 = vmor %vm377_vm1, %vm378_vm0 }
 0x785   :  { %v374_v63 = vsub.f32 1.0, %v373_v62 }
 0x787   :  { %v375_v0 = vmul.f32 %v860_v61, %v374_v63 }
 0x789   :  { %v376_v1 = vadd.f32 %v860_v61, %v375_v0 }
 0x78b   :  { %v380_v4 = vsel %vm379_vm12, %v860_v61, %v376_v1 }
 0x78c   :  { %v385_v7 = vsel %vm382_vm13, %v384_v5, %v380_v4 }
 0x78d   :  { %v391_v10 = vmul.f32 %v389_v9, %v385_v7 }
 0x7ea   :  { %v394_v6 = vpop.permute.xlu0 %393 }
 0x7eb   :  { %v396_v8 = vmul.f32 %v394_v6, %v385_v7 }
 0x7ed   :  { %398 = vrot.lane.b32.xlu1 %v396_v8, %s964_s4 }
 0x85f   :  { %v399_v11 = vpop.permute.xlu1 %398 }
 0x860   :  { %v401_v12 = vadd.f32 %v399_v11, %v391_v10 }
 0x862   :  { %861 = vtanh.f32 %v401_v12  ;;  %v459_v39 = vrot.slane %v401_v12, 7 }
 0x868   :  { %v862_v13 = vpop.eup %861 }
 0x869   :  { %404 = vrot.lane.b32.xlu2 %v862_v13, %s963_s2 }
 0x8c3   :  { %v405_v14 = vpop.permute.xlu2 %404 }
 0x8c4   :  { %v407_v15 = vmul.f32 %v405_v14, %v385_v7 }
 0x8c6   :  { %v409_v16 = vrot.slane %v407_v15, 3  ;;  %v690_v17 = vsel %vm92_vm2, %v689_v52, %v407_v15 }
 0x8c8   :  { %410 = vrot.lane.b32.xlu0 %v409_v16, %s964_s4 }
 0x93a   :  { %v411_v18 = vpop.permute.xlu0 %410 }
 0x93b   :  { %811 = vmatmul.msk.f32.vlgmr.msrb.gmra.mxu1 %vm110_vm7, %v411_v18 }
 0x9b8   :  { %v431_v19 = vpop.f32.mrf.mxu1 }
 0x9b9   :  { %v435_v20 = vrot.slane %v431_v19, 4 }
 0x9bb   :  { %v437_v21 = vadd.f32 %v435_v20, %v1136_v34 }
 0x9bd   :  { %863 = vtanh.f32 %v437_v21  ;;  %v812_v23 = vmul.f32 -1.442695, %v437_v21 }
 0x9bf   :  { %865 = vpow2.f32 %v812_v23 }
 0x9c3   :  { %v864_v22 = vpop.eup %863 }
 0x9c4   :  { %463 = vrot.lane.b32.xlu1 %v864_v22, %s963_s2 }
 0x9c5   :  { %v866_v24 = vpop.eup %865 }
 0x9c6   :  { %v441_v25 = vadd.f32 1.0, %v866_v24 }
 0x9c8   :  { %867 = vrcp.f32 %v441_v25  ;;  %v453_v31 = vand.u32 2147483648, %v441_v25  ;;  %vm447_vm14 = vweird.f32 %v441_v25  ;;  %v451_v32 = vand.u32 2147483647, %v441_v25 }
 0x9ca   :  { %v454_v35 = vor.u32 1.1754944e-38, %v453_v31  ;;  %vm452_vm8 = vcmp.eq.f32.partialorder %v451_v32, 8.507059e+37 }
 0x9ce   :  { %v868_v26 = vpop.eup %867 }
 0x9cf   :  { %v443_v27 = vmul.f32 %v868_v26, %v441_v25  ;;  %vm448_vm2 = vweird.f32 %v868_v26 }
 0x9d0   :  { %vm449_vm15 = vmor %vm447_vm14, %vm448_vm2 }
 0x9d1   :  { %v444_v28 = vsub.f32 1.0, %v443_v27 }
 0x9d3   :  { %v445_v29 = vmul.f32 %v868_v26, %v444_v28 }
 0x9d5   :  { %v446_v30 = vadd.f32 %v868_v26, %v445_v29 }
 0x9d7   :  { %v450_v33 = vsel %vm449_vm15, %v868_v26, %v446_v30 }
 0x9d8   :  { %v455_v37 = vsel %vm452_vm8, %v454_v35, %v450_v33 }
 0x9d9   :  { %v461_v40 = vmul.f32 %v459_v39, %v455_v37 }
 0xa36   :  { %v464_v36 = vpop.permute.xlu1 %463 }
 0xa37   :  { %v466_v38 = vmul.f32 %v464_v36, %v455_v37 }
 0xa39   :  { %468 = vrot.lane.b32.xlu2 %v466_v38, %s964_s4 }
 0xa93   :  { %v469_v41 = vpop.permute.xlu2 %468 }
 0xa94   :  { %v471_v42 = vadd.f32 %v469_v41, %v461_v40 }
 0xa96   :  { %869 = vtanh.f32 %v471_v42  ;;  %v529_v4 = vrot.slane %v471_v42, 7 }
 0xa9c   :  { %v870_v43 = vpop.eup %869 }
 0xa9d   :  { %474 = vrot.lane.b32.xlu0 %v870_v43, %s963_s2 }
 0xb0f   :  { %v475_v44 = vpop.permute.xlu0 %474 }
 0xb10   :  { %v477_v45 = vmul.f32 %v475_v44, %v455_v37 }
 0xb12   :  { %v479_v46 = vrot.slane %v477_v45, 4  ;;  %v691_v47 = vsel %vm94_vm3, %v690_v17, %v477_v45 }
 0xb14   :  { %480 = vrot.lane.b32.xlu1 %v479_v46, %s964_s4 }
 0xb86   :  { %v481_v48 = vpop.permute.xlu1 %480 }
 0xb87   :  { %813 = vmatmul.msk.f32.vlgmr.msrb.gmra.mxu2 %vm110_vm7, %v481_v48 }
 0xc0a   :  { %v501_v49 = vpop.f32.mrf.mxu2 }
 0xc0b   :  { %v505_v50 = vrot.slane %v501_v49, 3 }
 0xc0d   :  { %v507_v51 = vadd.f32 %v505_v50, %v1136_v34 }
 0xc0f   :  { %871 = vtanh.f32 %v507_v51  ;;  %v814_v53 = vmul.f32 -1.442695, %v507_v51 }
 0xc11   :  { %873 = vpow2.f32 %v814_v53 }
 0xc15   :  { %v872_v52 = vpop.eup %871 }
 0xc16   :  { %533 = vrot.lane.b32.xlu2 %v872_v52, %s963_s2 }
 0xc17   :  { %v874_v54 = vpop.eup %873 }
 0xc18   :  { %v511_v55 = vadd.f32 1.0, %v874_v54 }
 0xc1a   :  { %875 = vrcp.f32 %v511_v55  ;;  %v523_v61 = vand.u32 2147483648, %v511_v55  ;;  %vm517_vm9 = vweird.f32 %v511_v55  ;;  %v521_v62 = vand.u32 2147483647, %v511_v55 }
 0xc1c   :  { %v524_v0 = vor.u32 1.1754944e-38, %v523_v61  ;;  %vm522_vm11 = vcmp.eq.f32.partialorder %v521_v62, 8.507059e+37 }
 0xc20   :  { %v876_v56 = vpop.eup %875 }
 0xc21   :  { %v513_v58 = vmul.f32 %v876_v56, %v511_v55  ;;  %vm518_vm3 = vweird.f32 %v876_v56 }
 0xc22   :  { %vm519_vm10 = vmor %vm517_vm9, %vm518_vm3 }
 0xc23   :  { %v514_v59 = vsub.f32 1.0, %v513_v58 }
 0xc25   :  { %v515_v60 = vmul.f32 %v876_v56, %v514_v59 }
 0xc27   :  { %v516_v57 = vadd.f32 %v876_v56, %v515_v60 }
 0xc29   :  { %v520_v63 = vsel %vm519_vm10, %v876_v56, %v516_v57 }
 0xc2a   :  { %v525_v2 = vsel %vm522_vm11, %v524_v0, %v520_v63 }
 0xc2b   :  { %v531_v5 = vmul.f32 %v529_v4, %v525_v2 }
 0xc70   :  { %v534_v1 = vpop.permute.xlu2 %533 }
 0xc71   :  { %v536_v3 = vmul.f32 %v534_v1, %v525_v2 }
 0xc73   :  { %538 = vrot.lane.b32.xlu0 %v536_v3, %s964_s4 }
 0xce5   :  { %v539_v6 = vpop.permute.xlu0 %538 }
 0xce6   :  { %v541_v7 = vadd.f32 %v539_v6, %v531_v5  ;;  %v696_v6 = vld [vmem:[%s1220_s6] sm:$0xff]  ;;  %s966_s6 = smov [#allocation5]  }
 0xce7   :  { %s760_s13 = sshll.u32 %s966_s6, 4  ;;  %s761_s13 = int_to_ptr.vmem [resolvable:$true] %s760_s13 }
 0xce8   :  { %877 = vtanh.f32 %v541_v7  ;;  %v599_v33 = vrot.slane %v541_v7, 7  ;;  %v965_v7 = vmov 0  }
 0xce9   :  { %828 = vset.pattern.permute.xlu2 %v965_v7  ;;  %829 = vset.pattern.permute.xlu0 %v965_v7 }
 0xcee   :  { %v878_v8 = vpop.eup %877 }
 0xcef   :  { %544 = vrot.lane.b32.xlu1 %v878_v8, %s963_s2 }
 0xd61   :  { %v545_v9 = vpop.permute.xlu1 %544 }
 0xd62   :  { %v547_v10 = vmul.f32 %v545_v9, %v525_v2  ;;  %v695_v9 = vld [vmem:[%s1219_s5] sm:$0xff]  ;;  %s967_s5 = smov [#allocation6]  }
 0xd63   :  { %s771_s7 = sshll.u32 %s967_s5, 4  ;;  %s772_s7 = int_to_ptr.vmem [resolvable:$true] %s771_s7 }
 0xd64   :  { %v549_v11 = vrot.slane %v547_v10, 5  ;;  %v692_v12 = vsel %vm96_vm4, %v691_v47, %v547_v10 }
 0xd66   :  { %550 = vrot.lane.b32.xlu2 %v549_v11, %s964_s4 }
 0xdc0   :  { %v551_v13 = vpop.permute.xlu2 %550 }
 0xdc1   :  { %815 = vmatmul.msk.f32.vlgmr.msrb.gmra.mxu3 %vm110_vm7, %v551_v13 }
 0xe44   :  { %v571_v14 = vpop.f32.mrf.mxu3 }
 0xe45   :  { %v575_v15 = vrot.slane %v571_v14, 2 }
 0xe47   :  { %v577_v16 = vadd.f32 %v575_v15, %v1136_v34 }
 0xe49   :  { %879 = vtanh.f32 %v577_v16  ;;  %v816_v18 = vmul.f32 -1.442695, %v577_v16 }
 0xe4b   :  { %881 = vpow2.f32 %v816_v18 }
 0xe4f   :  { %v880_v17 = vpop.eup %879 }
 0xe50   :  { %603 = vrot.lane.b32.xlu0 %v880_v17, %s963_s2  ;;  %v738_v17 = vlaneseq }
 0xe51   :  { %v882_v19 = vpop.eup %881 }
 0xe52   :  { %v581_v20 = vadd.f32 1.0, %v882_v19 }
 0xe54   :  { %883 = vrcp.f32 %v581_v20  ;;  %v593_v26 = vand.u32 2147483648, %v581_v20  ;;  %vm587_vm0 = vweird.f32 %v581_v20  ;;  %v591_v27 = vand.u32 2147483647, %v581_v20 }
 0xe56   :  { %v594_v29 = vor.u32 1.1754944e-38, %v593_v26  ;;  %vm592_vm12 = vcmp.eq.f32.partialorder %v591_v27, 8.507059e+37 }
 0xe5a   :  { %v884_v21 = vpop.eup %883 }
 0xe5b   :  { %v583_v22 = vmul.f32 %v884_v21, %v581_v20  ;;  %vm588_vm4 = vweird.f32 %v884_v21  ;;  %v739_v20 = vshrl.u32 %v738_v17, 7 }
 0xe5c   :  { %vm589_vm1 = vmor %vm587_vm0, %vm588_vm4 }
 0xe5d   :  { %v584_v23 = vsub.f32 1.0, %v583_v22 }
 0xe5f   :  { %v585_v24 = vmul.f32 %v884_v21, %v584_v23 }
 0xe61   :  { %v586_v25 = vadd.f32 %v884_v21, %v585_v24 }
 0xe63   :  { %v590_v28 = vsel %vm589_vm1, %v884_v21, %v586_v25 }
 0xe64   :  { %v595_v31 = vsel %vm592_vm12, %v594_v29, %v590_v28 }
 0xe65   :  { %v601_v35 = vmul.f32 %v599_v33, %v595_v31 }
 0xec2   :  { %v604_v30 = vpop.permute.xlu0 %603 }
 0xec3   :  { %v606_v32 = vmul.f32 %v604_v30, %v595_v31 }
 0xec5   :  { %608 = vrot.lane.b32.xlu1 %v606_v32, %s964_s4 }
 0xf37   :  { %v609_v36 = vpop.permute.xlu1 %608 }
 0xf38   :  { %v611_v37 = vadd.f32 %v609_v36, %v601_v35 }
 0xf3a   :  { %885 = vtanh.f32 %v611_v37  ;;  %v669_v62 = vrot.slane %v611_v37, 7 }
 0xf40   :  { %v886_v38 = vpop.eup %885 }
 0xf41   :  { %614 = vrot.lane.b32.xlu2 %v886_v38, %s963_s2 }
 0xf9b   :  { %v615_v39 = vpop.permute.xlu2 %614 }
 0xf9c   :  { %v617_v40 = vmul.f32 %v615_v39, %v595_v31 }
 0xf9e   :  { %v619_v41 = vrot.slane %v617_v40, 6  ;;  %v693_v42 = vsel %vm98_vm5, %v692_v12, %v617_v40 }
 0xfa0   :  { %620 = vrot.lane.b32.xlu0 %v619_v41, %s964_s4 }
0x1012   :  { %v621_v43 = vpop.permute.xlu0 %620 }
0x1013   :  { %817 = vmatmul.msk.f32.vlgmr.msra.gmra.mxu0 %vm110_vm7, %v621_v43 }
0x1090   :  { %v641_v44 = vpop.f32.mrf.mxu0 }
0x1091   :  { %v645_v45 = vrot.slane %v641_v44, 1 }
0x1093   :  { %v647_v46 = vadd.f32 %v645_v45, %v1136_v34 }
0x1095   :  { %887 = vtanh.f32 %v647_v46  ;;  %v818_v48 = vmul.f32 -1.442695, %v647_v46 }
0x1097   :  { %889 = vpow2.f32 %v818_v48 }
0x109b   :  { %v888_v47 = vpop.eup %887 }
0x109c   :  { %673 = vrot.lane.b32.xlu1 %v888_v47, %s963_s2 }
0x109d   :  { %v890_v49 = vpop.eup %889 }
0x109e   :  { %v651_v50 = vadd.f32 1.0, %v890_v49 }
0x10a0   :  { %891 = vrcp.f32 %v651_v50  ;;  %v663_v56 = vand.u32 2147483648, %v651_v50  ;;  %vm657_vm13 = vweird.f32 %v651_v50  ;;  %v661_v58 = vand.u32 2147483647, %v651_v50 }
0x10a2   :  { %v664_v59 = vor.u32 1.1754944e-38, %v663_v56  ;;  %vm662_vm14 = vcmp.eq.f32.partialorder %v661_v58, 8.507059e+37 }
0x10a6   :  { %v892_v51 = vpop.eup %891 }
0x10a7   :  { %v653_v52 = vmul.f32 %v892_v51, %v651_v50  ;;  %vm658_vm5 = vweird.f32 %v892_v51 }
0x10a8   :  { %vm659_vm2 = vmor %vm657_vm13, %vm658_vm5 }
0x10a9   :  { %v654_v53 = vsub.f32 1.0, %v653_v52 }
0x10ab   :  { %v655_v54 = vmul.f32 %v892_v51, %v654_v53 }
0x10ad   :  { %v656_v55 = vadd.f32 %v892_v51, %v655_v54 }
0x10af   :  { %v660_v34 = vsel %vm659_vm2, %v892_v51, %v656_v55 }
0x10b0   :  { %v665_v57 = vsel %vm662_vm14, %v664_v59, %v660_v34 }
0x10b1   :  { %v671_v63 = vmul.f32 %v669_v62, %v665_v57 }
0x110e   :  { %v674_v60 = vpop.permute.xlu1 %673 }
0x110f   :  { %v676_v61 = vmul.f32 %v674_v60, %v665_v57 }
0x1111   :  { %678 = vrot.lane.b32.xlu2 %v676_v61, %s964_s4 }
0x1119   :  { %699 = vperm.xlu2 %828, %v696_v6  }
0x116b   :  { %v679_v0 = vpop.permute.xlu2 %678 }
0x116c   :  { %v681_v1 = vadd.f32 %v679_v0, %v671_v63 }
0x116e   :  { %893 = vtanh.f32 %v681_v1 }
0x1173   :  { %v700_v10 = vpop.permute.xlu2 %699 }
0x1174   :  { %v894_v2 = vpop.eup %893 }
0x1175   :  { %684 = vrot.lane.b32.xlu0 %v894_v2, %s963_s2 }
0x11e7   :  { %v685_v3 = vpop.permute.xlu0 %684 }
0x11e8   :  { %v687_v4 = vmul.f32 %v685_v3, %v665_v57 }
0x11ea   :  { %v694_v5 = vsel %vm100_vm6, %v693_v42, %v687_v4  ;;  %vm730_vm6 = vcmask 64512  }
0x11eb   :  { %703 = vrot.lane.b32.xlu1 %v694_v5, %s964_s4 }
0x125d   :  { %v704_v8 = vpop.permute.xlu1 %703 }
0x125e   :  { %819 = vmatpush.xpose.msk.msra.mxu1 %vm110_vm7, %v704_v8 }
0x1261   :  { %820 = vmatmul.msk.f32.vlgmr.msra.gmra.mxu1 %vm110_vm7, %v695_v9  ;;  %vm752_vm7 = vcmask 57344  }
0x12de   :  { %v727_v11 = vpop.f32.mrf.mxu1 }
0x12df   :  { %v728_v12 = vadd.f32 %v727_v11, %v700_v10 }
0x12e1   :  { %v731_v13 = vsel %vm730_vm6, %v728_v12, -inf }
0x12e2   :  { %v732_v14 = vrot.slane %v731_v13, 4 }
0x12e4   :  { %v733_v15 = vmax.f32 %v731_v13, %v732_v14 }
0x12e6   :  { %v734_v16 = vrot.slane %v733_v15, 2 }
0x12e8   :  { %v735_v18 = vmax.f32 %v733_v15, %v734_v16 }
0x12ea   :  { %v736_v19 = vrot.slane %v735_v18, 1 }
0x12ec   :  { %v737_v21 = vmax.f32 %v735_v18, %v736_v19 }
0x12ee   :  { %vm740_vm15 = vcmp.eq.f32.partialorder %v728_v12, %v737_v21  ;;  %753 = vst.msk [vmem:[#allocation5] sm:$0x1] %vm752_vm7, %v737_v21 }
0x12ef   :  { %v741_v22 = vsel %vm740_vm15, %v739_v20, 8  ;;  %765 = dma.vmem_to_hbm [thread:$0]  %s761_s13, 16, %s763_s15, [#allocation3]  }
0x12f0   :  { %v742_v23 = vsel %vm730_vm6, %v741_v22, 2147483647 }
0x12f1   :  { %v743_v24 = vrot.slane %v742_v23, 4 }
0x12f3   :  { %vm744_vm8 = vcmp.lt.s32.totalorder %v742_v23, %v743_v24 }
0x12f4   :  { %v745_v25 = vsel %vm744_vm8, %v742_v23, %v743_v24 }
0x12f5   :  { %v746_v26 = vrot.slane %v745_v25, 2 }
0x12f7   :  { %vm747_vm3 = vcmp.lt.s32.totalorder %v745_v25, %v746_v26 }
0x12f8   :  { %v748_v27 = vsel %vm747_vm3, %v745_v25, %v746_v26 }
0x12f9   :  { %v749_v28 = vrot.slane %v748_v27, 1 }
0x12fb   :  { %vm750_vm9 = vcmp.lt.s32.totalorder %v748_v27, %v749_v28 }
0x12fc   :  { %v751_v29 = vsel %vm750_vm9, %v748_v27, %v749_v28 }
0x12fd   :  { %754 = vst.msk [vmem:[#allocation6] sm:$0x1] %vm752_vm7, %v751_v29 }
0x12fe   :  { %776 = dma.vmem_to_hbm [thread:$0]  %s772_s7, 16, %s774_s18, [#allocation7]  }
0x12ff   :  { %957 = dma.done.wait [#allocation3], 16  }
0x1300   :  { %958 = vsyncadd [#allocation3], 4294967280 }
0x1301   :  { %959 = dma.done.wait [#allocation7], 16  }
0x1302   :  { %960 = vsyncadd [#allocation7], 4294967280 }
0x1303   :  { %785 = vsyncpa [#allocation3], 1 }
0x1304   :  { %786 = vsyncpa [#allocation7], 1 }
0x1305   :  { %787 = vsyncpa [#allocation4], 1 }

</bundles_post_ra>
